<compile_context>
chip_gen: v7x
topology: tpu7x:2x2x1
jax: 0.10.0
libtpu: 0.0.40
codegen_flags: <defaults>
</compile_context>

<pallas_src>
import functools

import jax
import jax.numpy as jnp
from jax.experimental import pallas as pl
from jax.experimental.pallas import tpu as pltpu


def _round_up(x, m):
    return ((x + m - 1) // m) * m


# -----------------------------------------------------------------------------
# Kernel: full MLP fused in one grid step per row tile.
# -----------------------------------------------------------------------------
def _fused_mlp_kernel(*refs, n_layers, compute_dtype):
    """refs = (x_ref, w0_ref, b0_ref, ..., w{L-1}_ref, b{L-1}_ref, o_ref).

    Matmul operands are cast to `compute_dtype` (bf16 -> native MXU rate);
    accumulation, bias add and ReLU stay in f32 (fast VPU path, incl. v5e).
    """
    x_ref = refs[0]
    o_ref = refs[-1]
    wb_refs = refs[1:-1]

    h = x_ref[...].astype(jnp.float32)
    for li in range(n_layers):
        w = wb_refs[2 * li][...]                              # (K_pad, N_pad)
        b = wb_refs[2 * li + 1][...].astype(jnp.float32)      # (1, N_pad) bcast
        h = jnp.dot(h.astype(compute_dtype), w,
                    preferred_element_type=jnp.float32) + b
        if li != n_layers - 1:
            h = jnp.maximum(h, 0.0)                           # ReLU, hidden only
    o_ref[...] = h.astype(o_ref.dtype)


# -----------------------------------------------------------------------------
# One-time parameter preparation (padding + optional bf16 cast).
# -----------------------------------------------------------------------------
class PreparedMLPParams:
    """Lane-dense, zero-padded weights/biases, reusable across forward calls."""

    def __init__(self, padded, d_in, n_out, k_pad, n_out_pad, weights_dtype):
        self.padded = padded              # (w0, b0, w1, b1, ...) padded arrays
        self.d_in = d_in
        self.n_out = n_out
        self.k_pad = k_pad
        self.n_out_pad = n_out_pad
        self.weights_dtype = weights_dtype


def prepare_batch_mlp_params(params, *, weights_dtype=jnp.bfloat16):
    """Pad every (w:(k,n), b:(n,)) once to (K_pad, N_pad)/(1, N_pad)."""
    d_in = params[0][0].shape[0]
    n_out = params[-1][0].shape[1]
    k_pad = _round_up(d_in, 128)

    fan_in_pad = k_pad
    padded = []
    for (w, b) in params:
        k, n = w.shape
        n_pad = _round_up(n, 128)
        w_p = (jnp.zeros((fan_in_pad, n_pad), jnp.float32)
               .at[:k, :n].set(w.astype(jnp.float32))
               .astype(weights_dtype))
        b_p = jnp.zeros((1, n_pad), jnp.float32).at[0, :n].set(b)   # bias stays f32
        padded += [w_p, b_p]
        fan_in_pad = n_pad

    return PreparedMLPParams(tuple(padded), d_in, n_out, k_pad, fan_in_pad,
                             weights_dtype)


# -----------------------------------------------------------------------------
# Row tiling: minimal padding waste, >= 2 grid steps for mid/large M (v7x TCs).
# -----------------------------------------------------------------------------
def _choose_row_tiling(M, max_tm):
    m8 = _round_up(max(M, 1), 8)
    if m8 <= 256:
        return m8, m8                                  # grid=(1,), no overhead
    n_tiles = max(2, pl.cdiv(m8, max_tm))              # >=2 steps -> both v7x TCs
    tm = _round_up(pl.cdiv(m8, n_tiles), 8)
    return tm, _round_up(m8, tm)


# -----------------------------------------------------------------------------
# pallas_call wrapper.
# -----------------------------------------------------------------------------
_SINGLE_BUFFER_WEIGHTS_OK = None        # probed once: pl.Buffered(1) support


def _run_fused_mlp(x_p, prepared, tm, single_buffer):
    M_pad, k_pad = x_p.shape
    padded = prepared.padded
    n_layers = len(padded) // 2
    n_out_pad = prepared.n_out_pad

    # Constant index_map -> weights/biases stay resident across grid steps;
    # single-buffering them halves their VMEM footprint (key on v7x, 64 MiB).
    w_pipeline = dict(pipeline_mode=pl.Buffered(1)) if single_buffer else {}

    in_specs = [pl.BlockSpec((tm, k_pad), lambda i: (i, 0))]
    flops = 0
    for li in range(n_layers):
        kp, np_ = padded[2 * li].shape
        in_specs.append(pl.BlockSpec((kp, np_), lambda i: (0, 0), **w_pipeline))
        in_specs.append(pl.BlockSpec((1, np_), lambda i: (0, 0), **w_pipeline))
        flops += 2 * M_pad * kp * np_

    # Explicit VMEM budget: resident params + pipelined x/out tiles + activation
    # temporaries, with ~25% headroom.  Clamped to be safe on all generations
    # (v5e default scoped is only 16 MiB; v7x physical VMEM is 64 MiB).
    param_bytes = sum(int(a.size) * a.dtype.itemsize for a in padded)
    io_bytes = 2 * tm * k_pad * x_p.dtype.itemsize \
        + 2 * tm * n_out_pad * x_p.dtype.itemsize
    act_bytes = 2 * tm * max(a.shape[-1] for a in padded) * 4
    vmem_need = (1 if single_buffer else 2) * param_bytes + io_bytes + act_bytes
    vmem_limit = min(48 << 20, max(16 << 20, int(vmem_need * 1.25) + (2 << 20)))

    bytes_accessed = (x_p.size * x_p.dtype.itemsize
                      + param_bytes
                      + M_pad * n_out_pad * x_p.dtype.itemsize)

    kernel = functools.partial(_fused_mlp_kernel, n_layers=n_layers,
                               compute_dtype=prepared.weights_dtype)
    return pl.pallas_call(
        kernel,
        out_shape=jax.ShapeDtypeStruct((M_pad, n_out_pad), x_p.dtype),
        grid_spec=pltpu.PrefetchScalarGridSpec(
            num_scalar_prefetch=0,
            grid=(M_pad // tm,),
            in_specs=in_specs,
            out_specs=pl.BlockSpec((tm, n_out_pad), lambda i: (i, 0)),
        ),
        compiler_params=pltpu.CompilerParams(
            dimension_semantics=("parallel",),
            vmem_limit_bytes=vmem_limit,
        ),
        cost_estimate=pl.CostEstimate(
            flops=flops, transcendentals=0, bytes_accessed=bytes_accessed),
    )(x_p, *padded)


def batch_mlp_forward(x, prepared, *, max_tm=512, dropout=0.0):
    """Pallas implementation of batch_mlp.forward.

    x: (..., d_in); prepared: PreparedMLPParams from prepare_batch_mlp_params.
    """
    if dropout != 0.0:
        # TODO(synk): training-mode dropout needs pltpu.prng_random_bits.
        raise NotImplementedError(
            "batch_mlp Pallas kernel only supports dropout=0.0 (eval mode)")
    global _SINGLE_BUFFER_WEIGHTS_OK

    lead_shape = x.shape[:-1]
    d_in = x.shape[-1]
    assert d_in == prepared.d_in, (d_in, prepared.d_in)

    xf = x.reshape(-1, d_in)
    M = xf.shape[0]
    tm, M_pad = _choose_row_tiling(M, max_tm)
    x_p = jnp.zeros((M_pad, prepared.k_pad), xf.dtype).at[:M, :d_in].set(xf)

    if _SINGLE_BUFFER_WEIGHTS_OK is None:
        try:  # probe pl.Buffered(1) support once; fall back if rejected.
            out = jax.block_until_ready(_run_fused_mlp(x_p, prepared, tm, True))
            _SINGLE_BUFFER_WEIGHTS_OK = True
        except Exception:
            _SINGLE_BUFFER_WEIGHTS_OK = False
            out = _run_fused_mlp(x_p, prepared, tm, False)
    else:
        out = _run_fused_mlp(x_p, prepared, tm, _SINGLE_BUFFER_WEIGHTS_OK)

    return out[:M, :prepared.n_out].reshape(*lead_shape, prepared.n_out)


# -----------------------------------------------------------------------------
# Init + plain-JAX reference.
# -----------------------------------------------------------------------------
def init_batch_mlp_params(key, d_in, output_sizes):
    """Deterministic init mimicking nn.Linear default (uniform +-1/sqrt(fan_in))."""
    params = []
    fan_in = d_in
    for d_out in output_sizes:
        key, kw, kb = jax.random.split(key, 3)
        bound = 1.0 / jnp.sqrt(fan_in)
        w = jax.random.uniform(kw, (fan_in, d_out), jnp.float32, -bound, bound)
        b = jax.random.uniform(kb, (d_out,), jnp.float32, -bound, bound)
        params.append((w, b))
        fan_in = d_out
    return params


def batch_mlp_reference(x, params):
    n_layers = len(params)
    for li, (w, b) in enumerate(params):
        x = x @ w + b
        if li != n_layers - 1:
            x = jnp.maximum(x, 0.0)
    return x


if __name__ == "__main__":
    key = jax.random.PRNGKey(0)

    batch, seq, d_in = 2, 8, 32
    output_sizes = (64, 64, 32)

    kx, kp = jax.random.split(key)
    x = jax.random.normal(kx, (batch, seq, d_in), jnp.float32)
    params = init_batch_mlp_params(kp, d_in, output_sizes)
    ref = batch_mlp_reference(x, params)

    # f32 weights: bit-tight check against the reference.
    prep_f32 = prepare_batch_mlp_params(params, weights_dtype=jnp.float32)
    out = jax.block_until_ready(batch_mlp_forward(x, prep_f32))
    assert out.shape == (batch, seq, output_sizes[-1])
    assert jnp.allclose(out, ref, atol=1e-5, rtol=1e-5)

    # bf16 weights (default, native MXU rate): relaxed tolerance.
    prep_bf16 = prepare_batch_mlp_params(params)
    out_bf = jax.block_until_ready(batch_mlp_forward(x, prep_bf16))
    assert out_bf.shape == (batch, seq, output_sizes[-1])
    assert jnp.allclose(out_bf, ref, atol=3e-2, rtol=3e-2)

    # Ragged leading shape (batch*seq not a multiple of 8).
    x2 = jax.random.normal(kx, (3, 7, d_in), jnp.float32)
    out2 = jax.block_until_ready(batch_mlp_forward(x2, prep_f32))
    ref2 = batch_mlp_reference(x2, params)
    assert out2.shape == (3, 7, output_sizes[-1])
    assert jnp.allclose(out2, ref2, atol=1e-5, rtol=1e-5)

    # Larger M: exercises the multi-step row grid (>= 2 parallel tiles).
    x3 = jax.random.normal(kx, (65, 9, d_in), jnp.float32)
    out3 = jax.block_until_ready(batch_mlp_forward(x3, prep_f32))
    ref3 = batch_mlp_reference(x3, params)
    assert out3.shape == (65, 9, output_sizes[-1])
    assert jnp.allclose(out3, ref3, atol=1e-5, rtol=1e-5)

    print("KERNEL_OK")
</pallas_src>

<mosaic_0001>
module attributes {stable_mosaic.version = 11 : i64} {
  func.func @_fused_mlp_kernel(%arg0: i32, %arg1: memref<16x128xf32, #tpu.memory_space<vmem>>, %arg2: memref<128x128xf32, #tpu.memory_space<vmem>>, %arg3: memref<1x128xf32, #tpu.memory_space<vmem>>, %arg4: memref<128x128xf32, #tpu.memory_space<vmem>>, %arg5: memref<1x128xf32, #tpu.memory_space<vmem>>, %arg6: memref<128x128xf32, #tpu.memory_space<vmem>>, %arg7: memref<1x128xf32, #tpu.memory_space<vmem>>, %arg8: memref<16x128xf32, #tpu.memory_space<vmem>>) attributes {dimension_semantics = [#tpu.dimension_semantics<parallel>], iteration_bounds = array<i64: 1>, scalar_prefetch = 0 : i64, scratch_operands = 0 : i64, tpu.core_type = #tpu.core_type<tc>, window_params = [{transform_indices = @transform_0, window_bounds = array<i64: 16, 128>}, {pipeline_mode = #tpu.pipeline_mode<synchronous>, transform_indices = @transform_1, window_bounds = array<i64: 128, 128>}, {pipeline_mode = #tpu.pipeline_mode<synchronous>, transform_indices = @transform_2, window_bounds = array<i64: 1, 128>}, {pipeline_mode = #tpu.pipeline_mode<synchronous>, transform_indices = @transform_3, window_bounds = array<i64: 128, 128>}, {pipeline_mode = #tpu.pipeline_mode<synchronous>, transform_indices = @transform_4, window_bounds = array<i64: 1, 128>}, {pipeline_mode = #tpu.pipeline_mode<synchronous>, transform_indices = @transform_5, window_bounds = array<i64: 128, 128>}, {pipeline_mode = #tpu.pipeline_mode<synchronous>, transform_indices = @transform_6, window_bounds = array<i64: 1, 128>}, {transform_indices = @transform_7, window_bounds = array<i64: 16, 128>}]} {
    %c0 = arith.constant 0 : index
    %c0_0 = arith.constant 0 : index
    %0 = vector.load %arg1[%c0, %c0_0] : memref<16x128xf32, #tpu.memory_space<vmem>>, vector<16x128xf32>
    %c0_1 = arith.constant 0 : index
    %c0_2 = arith.constant 0 : index
    %1 = vector.load %arg2[%c0_1, %c0_2] : memref<128x128xf32, #tpu.memory_space<vmem>>, vector<128x128xf32>
    %c0_3 = arith.constant 0 : index
    %c0_4 = arith.constant 0 : index
    %2 = vector.load %arg3[%c0_3, %c0_4] : memref<1x128xf32, #tpu.memory_space<vmem>>, vector<1x128xf32>
    %cst = arith.constant dense<0.000000e+00> : vector<16x128xf32>
    %3 = tpu.matmul %0, %1, %cst {dimension_numbers = #tpu.dot_dimension_numbers<[1], [0], [0], [1], [0, 0, 1, 1], [], []>} : vector<16x128xf32>, vector<128x128xf32>, vector<16x128xf32> -> vector<16x128xf32>
    %4 = vector.broadcast %2 : vector<1x128xf32> to vector<16x128xf32>
    %5 = arith.addf %3, %4 : vector<16x128xf32>
    %cst_5 = arith.constant 0.000000e+00 : f32
    %6 = vector.broadcast %cst_5 : f32 to vector<16x128xf32>
    %7 = arith.maximumf %5, %6 : vector<16x128xf32>
    %c0_6 = arith.constant 0 : index
    %c0_7 = arith.constant 0 : index
    %8 = vector.load %arg4[%c0_6, %c0_7] : memref<128x128xf32, #tpu.memory_space<vmem>>, vector<128x128xf32>
    %c0_8 = arith.constant 0 : index
    %c0_9 = arith.constant 0 : index
    %9 = vector.load %arg5[%c0_8, %c0_9] : memref<1x128xf32, #tpu.memory_space<vmem>>, vector<1x128xf32>
    %cst_10 = arith.constant dense<0.000000e+00> : vector<16x128xf32>
    %10 = tpu.matmul %7, %8, %cst_10 {dimension_numbers = #tpu.dot_dimension_numbers<[1], [0], [0], [1], [0, 0, 1, 1], [], []>} : vector<16x128xf32>, vector<128x128xf32>, vector<16x128xf32> -> vector<16x128xf32>
    %11 = vector.broadcast %9 : vector<1x128xf32> to vector<16x128xf32>
    %12 = arith.addf %10, %11 : vector<16x128xf32>
    %cst_11 = arith.constant 0.000000e+00 : f32
    %13 = vector.broadcast %cst_11 : f32 to vector<16x128xf32>
    %14 = arith.maximumf %12, %13 : vector<16x128xf32>
    %c0_12 = arith.constant 0 : index
    %c0_13 = arith.constant 0 : index
    %15 = vector.load %arg6[%c0_12, %c0_13] : memref<128x128xf32, #tpu.memory_space<vmem>>, vector<128x128xf32>
    %c0_14 = arith.constant 0 : index
    %c0_15 = arith.constant 0 : index
    %16 = vector.load %arg7[%c0_14, %c0_15] : memref<1x128xf32, #tpu.memory_space<vmem>>, vector<1x128xf32>
    %cst_16 = arith.constant dense<0.000000e+00> : vector<16x128xf32>
    %17 = tpu.matmul %14, %15, %cst_16 {dimension_numbers = #tpu.dot_dimension_numbers<[1], [0], [0], [1], [0, 0, 1, 1], [], []>} : vector<16x128xf32>, vector<128x128xf32>, vector<16x128xf32> -> vector<16x128xf32>
    %18 = vector.broadcast %16 : vector<1x128xf32> to vector<16x128xf32>
    %19 = arith.addf %17, %18 : vector<16x128xf32>
    %c0_17 = arith.constant 0 : index
    %c0_18 = arith.constant 0 : index
    %20 = vector.load %arg8[%c0_17, %c0_18] : memref<16x128xf32, #tpu.memory_space<vmem>>, vector<16x128xf32>
    tpu.vector_store %arg8[%c0_17, %c0_18], %19 {strides = array<i32>} : memref<16x128xf32, #tpu.memory_space<vmem>>, vector<16x128xf32>,
    return
  }
  func.func @transform_0(%arg0: i32) -> (i32, i32) {
    %c0_i32 = arith.constant 0 : i32
    %c0_i32_0 = arith.constant 0 : i32
    return %arg0, %c0_i32 : i32, i32
  }
  func.func @transform_1(%arg0: i32) -> (i32, i32) {
    %c0_i32 = arith.constant 0 : i32
    %c0_i32_0 = arith.constant 0 : i32
    %c0_i32_1 = arith.constant 0 : i32
    return %c0_i32, %c0_i32_0 : i32, i32
  }
  func.func @transform_2(%arg0: i32) -> (i32, i32) {
    %c0_i32 = arith.constant 0 : i32
    %c0_i32_0 = arith.constant 0 : i32
    %c0_i32_1 = arith.constant 0 : i32
    return %c0_i32, %c0_i32_0 : i32, i32
  }
  func.func @transform_3(%arg0: i32) -> (i32, i32) {
    %c0_i32 = arith.constant 0 : i32
    %c0_i32_0 = arith.constant 0 : i32
    %c0_i32_1 = arith.constant 0 : i32
    return %c0_i32, %c0_i32_0 : i32, i32
  }
  func.func @transform_4(%arg0: i32) -> (i32, i32) {
    %c0_i32 = arith.constant 0 : i32
    %c0_i32_0 = arith.constant 0 : i32
    %c0_i32_1 = arith.constant 0 : i32
    return %c0_i32, %c0_i32_0 : i32, i32
  }
  func.func @transform_5(%arg0: i32) -> (i32, i32) {
    %c0_i32 = arith.constant 0 : i32
    %c0_i32_0 = arith.constant 0 : i32
    %c0_i32_1 = arith.constant 0 : i32
    return %c0_i32, %c0_i32_0 : i32, i32
  }
  func.func @transform_6(%arg0: i32) -> (i32, i32) {
    %c0_i32 = arith.constant 0 : i32
    %c0_i32_0 = arith.constant 0 : i32
    %c0_i32_1 = arith.constant 0 : i32
    return %c0_i32, %c0_i32_0 : i32, i32
  }
  func.func @transform_7(%arg0: i32) -> (i32, i32) {
    %c0_i32 = arith.constant 0 : i32
    %c0_i32_0 = arith.constant 0 : i32
    return %arg0, %c0_i32 : i32, i32
  }
}

module attributes {stable_mosaic.version = 11 : i64} {
  func.func @_fused_mlp_kernel(%arg0: i32, %arg1: memref<16x128xf32, #tpu.memory_space<vmem>>, %arg2: memref<128x128xf32, #tpu.memory_space<vmem>>, %arg3: memref<1x128xf32, #tpu.memory_space<vmem>>, %arg4: memref<128x128xf32, #tpu.memory_space<vmem>>, %arg5: memref<1x128xf32, #tpu.memory_space<vmem>>, %arg6: memref<128x128xf32, #tpu.memory_space<vmem>>, %arg7: memref<1x128xf32, #tpu.memory_space<vmem>>, %arg8: memref<16x128xf32, #tpu.memory_space<vmem>>) attributes {dimension_semantics = [#tpu.dimension_semantics<parallel>], iteration_bounds = array<i64: 1>, scalar_prefetch = 0 : i64, scratch_operands = 0 : i64, tpu.core_type = #tpu.core_type<tc>, window_params = [{transform_indices = @transform_0, window_bounds = array<i64: 16, 128>}, {pipeline_mode = #tpu.pipeline_mode<synchronous>, transform_indices = @transform_1, window_bounds = array<i64: 128, 128>}, {pipeline_mode = #tpu.pipeline_mode<synchronous>, transform_indices = @transform_2, window_bounds = array<i64: 1, 128>}, {pipeline_mode = #tpu.pipeline_mode<synchronous>, transform_indices = @transform_3, window_bounds = array<i64: 128, 128>}, {pipeline_mode = #tpu.pipeline_mode<synchronous>, transform_indices = @transform_4, window_bounds = array<i64: 1, 128>}, {pipeline_mode = #tpu.pipeline_mode<synchronous>, transform_indices = @transform_5, window_bounds = array<i64: 128, 128>}, {pipeline_mode = #tpu.pipeline_mode<synchronous>, transform_indices = @transform_6, window_bounds = array<i64: 1, 128>}, {transform_indices = @transform_7, window_bounds = array<i64: 16, 128>}]} {
    %c0 = arith.constant 0 : index
    %c0_0 = arith.constant 0 : index
    %0 = vector.load %arg1[%c0, %c0_0] : memref<16x128xf32, #tpu.memory_space<vmem>>, vector<16x128xf32>
    %c0_1 = arith.constant 0 : index
    %c0_2 = arith.constant 0 : index
    %1 = vector.load %arg2[%c0_1, %c0_2] : memref<128x128xf32, #tpu.memory_space<vmem>>, vector<128x128xf32>
    %c0_3 = arith.constant 0 : index
    %c0_4 = arith.constant 0 : index
    %2 = vector.load %arg3[%c0_3, %c0_4] : memref<1x128xf32, #tpu.memory_space<vmem>>, vector<1x128xf32>
    %cst = arith.constant dense<0.000000e+00> : vector<16x128xf32>
    %3 = tpu.matmul %0, %1, %cst {dimension_numbers = #tpu.dot_dimension_numbers<[1], [0], [0], [1], [0, 0, 1, 1], [], []>} : vector<16x128xf32>, vector<128x128xf32>, vector<16x128xf32> -> vector<16x128xf32>
    %4 = vector.broadcast %2 : vector<1x128xf32> to vector<16x128xf32>
    %5 = arith.addf %3, %4 : vector<16x128xf32>
    %cst_5 = arith.constant 0.000000e+00 : f32
    %6 = vector.broadcast %cst_5 : f32 to vector<16x128xf32>
    %7 = arith.maximumf %5, %6 : vector<16x128xf32>
    %c0_6 = arith.constant 0 : index
    %c0_7 = arith.constant 0 : index
    %8 = vector.load %arg4[%c0_6, %c0_7] : memref<128x128xf32, #tpu.memory_space<vmem>>, vector<128x128xf32>
    %c0_8 = arith.constant 0 : index
    %c0_9 = arith.constant 0 : index
    %9 = vector.load %arg5[%c0_8, %c0_9] : memref<1x128xf32, #tpu.memory_space<vmem>>, vector<1x128xf32>
    %cst_10 = arith.constant dense<0.000000e+00> : vector<16x128xf32>
    %10 = tpu.matmul %7, %8, %cst_10 {dimension_numbers = #tpu.dot_dimension_numbers<[1], [0], [0], [1], [0, 0, 1, 1], [], []>} : vector<16x128xf32>, vector<128x128xf32>, vector<16x128xf32> -> vector<16x128xf32>
    %11 = vector.broadcast %9 : vector<1x128xf32> to vector<16x128xf32>
    %12 = arith.addf %10, %11 : vector<16x128xf32>
    %cst_11 = arith.constant 0.000000e+00 : f32
    %13 = vector.broadcast %cst_11 : f32 to vector<16x128xf32>
    %14 = arith.maximumf %12, %13 : vector<16x128xf32>
    %c0_12 = arith.constant 0 : index
    %c0_13 = arith.constant 0 : index
    %15 = vector.load %arg6[%c0_12, %c0_13] : memref<128x128xf32, #tpu.memory_space<vmem>>, vector<128x128xf32>
    %c0_14 = arith.constant 0 : index
    %c0_15 = arith.constant 0 : index
    %16 = vector.load %arg7[%c0_14, %c0_15] : memref<1x128xf32, #tpu.memory_space<vmem>>, vector<1x128xf32>
    %cst_16 = arith.constant dense<0.000000e+00> : vector<16x128xf32>
    %17 = tpu.matmul %14, %15, %cst_16 {dimension_numbers = #tpu.dot_dimension_numbers<[1], [0], [0], [1], [0, 0, 1, 1], [], []>} : vector<16x128xf32>, vector<128x128xf32>, vector<16x128xf32> -> vector<16x128xf32>
    %18 = vector.broadcast %16 : vector<1x128xf32> to vector<16x128xf32>
    %19 = arith.addf %17, %18 : vector<16x128xf32>
    %c0_17 = arith.constant 0 : index
    %c0_18 = arith.constant 0 : index
    %20 = vector.load %arg8[%c0_17, %c0_18] : memref<16x128xf32, #tpu.memory_space<vmem>>, vector<16x128xf32>
    tpu.vector_store %arg8[%c0_17, %c0_18], %19 {strides = array<i32>} : memref<16x128xf32, #tpu.memory_space<vmem>>, vector<16x128xf32>,
    return
  }
  func.func @transform_0(%arg0: i32) -> (i32, i32) {
    %c0_i32 = arith.constant 0 : i32
    %c0_i32_0 = arith.constant 0 : i32
    return %arg0, %c0_i32 : i32, i32
  }
  func.func @transform_1(%arg0: i32) -> (i32, i32) {
    %c0_i32 = arith.constant 0 : i32
    %c0_i32_0 = arith.constant 0 : i32
    %c0_i32_1 = arith.constant 0 : i32
    return %c0_i32, %c0_i32_0 : i32, i32
  }
  func.func @transform_2(%arg0: i32) -> (i32, i32) {
    %c0_i32 = arith.constant 0 : i32
    %c0_i32_0 = arith.constant 0 : i32
    %c0_i32_1 = arith.constant 0 : i32
    return %c0_i32, %c0_i32_0 : i32, i32
  }
  func.func @transform_3(%arg0: i32) -> (i32, i32) {
    %c0_i32 = arith.constant 0 : i32
    %c0_i32_0 = arith.constant 0 : i32
    %c0_i32_1 = arith.constant 0 : i32
    return %c0_i32, %c0_i32_0 : i32, i32
  }
  func.func @transform_4(%arg0: i32) -> (i32, i32) {
    %c0_i32 = arith.constant 0 : i32
    %c0_i32_0 = arith.constant 0 : i32
    %c0_i32_1 = arith.constant 0 : i32
    return %c0_i32, %c0_i32_0 : i32, i32
  }
  func.func @transform_5(%arg0: i32) -> (i32, i32) {
    %c0_i32 = arith.constant 0 : i32
    %c0_i32_0 = arith.constant 0 : i32
    %c0_i32_1 = arith.constant 0 : i32
    return %c0_i32, %c0_i32_0 : i32, i32
  }
  func.func @transform_6(%arg0: i32) -> (i32, i32) {
    %c0_i32 = arith.constant 0 : i32
    %c0_i32_0 = arith.constant 0 : i32
    %c0_i32_1 = arith.constant 0 : i32
    return %c0_i32, %c0_i32_0 : i32, i32
  }
  func.func @transform_7(%arg0: i32) -> (i32, i32) {
    %c0_i32 = arith.constant 0 : i32
    %c0_i32_0 = arith.constant 0 : i32
    return %arg0, %c0_i32 : i32, i32
  }
}

</mosaic_0001>

<bundles_post_ra>
// kernel: tpu_custom_call.1
= control target key start
LH: loop header
LB: loop body
LE: loop exit
PB: predicated region body
PF: predicated region fallthrough
CT: control target
= control target key end

     0   :  { %12 = vsyncpa [#allocation3], 0  ;;  %s931_s0 = inlined_call_operand.hbm [shape: f32[16,128], index: 0, kind: input, shape index: {}]   ;;  %s932_s1 = inlined_call_operand.hbm [shape: f32[128,128], index: 1, kind: input, shape index: {}]   ;;  %s933_s2 = inlined_call_operand.vmem [shape: f32[1,128], index: 2, kind: input, shape index: {}]   ;;  %s934_s3 = inlined_call_operand.hbm [shape: f32[128,128], index: 3, kind: input, shape index: {}]   ;;  %s935_s4 = inlined_call_operand.vmem [shape: f32[1,128], index: 4, kind: input, shape index: {}]   ;;  %s936_s5 = inlined_call_operand.hbm [shape: f32[128,128], index: 5, kind: input, shape index: {}]   ;;  %s937_s6 = inlined_call_operand.vmem [shape: f32[1,128], index: 6, kind: input, shape index: {}]   ;;  %s938_s7 = inlined_call_operand.hbm [shape: f32[16,128], index: 7, kind: output, shape index: {}]  }
   0x1   :  { %13 = vsyncpa [#allocation6], 0 }
   0x2   :  { %14 = vsyncpa [#allocation9], 0 }
   0x3   :  { %15 = vsyncpa [#allocation4], 0  ;;  %s786_s24 = smov [#allocation5]   ;;  %s787_s26 = smov [#allocation2]  }
   0x4   :  { %s33_s25 = sshll.u32 %s786_s24, 4  ;;  %s21_s27 = sshll.u32 %s787_s26, 4  ;;  %s34_s25 = int_to_ptr.vmem [resolvable:$true] %s33_s25  ;;  %s833_s27 = int_to_ptr.vmem [resolvable:$true] %s21_s27 }
   0x5   :  { %s668_s30 = scalar_lea.hbm %s932_s1, 2048 }
   0x6   :  { %p669_p0 = scmp.ne.s32.totalorder %s932_s1, %s668_s30  ;;  %p672_p1 = scmp.lt.u32.totalorder %s668_s30, %s932_s1 }
   0x8   :  { %p674_p2 = pnand %p672_p1, %p669_p0 }
   0xa   :  { %677 = shalt.err (!%p674_p2)
}
   0xb   :  { %s678_s12 = scalar_lea.vmem %s34_s25, 2048  ;;  %p683_p4 = scmp.lt.s32.totalorder %s34_s25, %s34_s25 }
   0xc   :  { %p679_p3 = scmp.ne.s32.totalorder %s34_s25, %s678_s12  ;;  %p684_p5 = scmp.lt.s32.totalorder %s678_s12, %s678_s12 }
   0xe   :  { %p685_p6 = por %p684_p5, %p683_p4 }
  0x10   :  { %p686_p7 = pnand %p685_p6, %p679_p3 }
  0x12   :  { %689 = shalt.err (!%p686_p7)
}
  0x13   :  { %s788_s13 = smov 128   ;;  %s789_s14 = smov 8  }
  0x14   :  { %39 = dma.hbm_to_vmem [thread:$0]  %s932_s1, 2048, %s34_s25, [#allocation6], %s788_s13, %s788_s13, %s789_s14  }
  0x15   :  { %s690_s19 = scalar_lea.hbm %s931_s0, 256 }
  0x16   :  { %p691_p8 = scmp.ne.s32.totalorder %s931_s0, %s690_s19  ;;  %p694_p9 = scmp.lt.u32.totalorder %s690_s19, %s931_s0 }
  0x18   :  { %p696_p10 = pnand %p694_p9, %p691_p8 }
  0x1a   :  { %699 = shalt.err (!%p696_p10)
}
  0x1b   :  { %s700_s24 = scalar_lea.vmem %s833_s27, 256  ;;  %p705_p12 = scmp.lt.s32.totalorder %s833_s27, %s833_s27 }
  0x1c   :  { %p701_p11 = scmp.ne.s32.totalorder %s833_s27, %s700_s24  ;;  %p706_p13 = scmp.lt.s32.totalorder %s700_s24, %s700_s24 }
  0x1e   :  { %p707_p0 = por %p706_p13, %p705_p12 }
  0x20   :  { %p708_p1 = pnand %p707_p0, %p701_p11 }
  0x22   :  { %711 = shalt.err (!%p708_p1)
}
  0x23   :  { %27 = dma.hbm_to_vmem [thread:$0]  %s931_s0, 256, %s833_s27, [#allocation3], %s788_s13, %s788_s13, %s789_s14  }
  0x24   :  { %s790_s26 = smov [#allocation7]   ;;  %s791_s29 = smov [#allocation8]  }
  0x25   :  { %s47_s28 = sshll.u32 %s790_s26, 4  ;;  %s61_s30 = sshll.u32 %s791_s29, 4  ;;  %s48_s28 = int_to_ptr.vmem [resolvable:$true] %s47_s28  ;;  %s870_s30 = int_to_ptr.vmem [resolvable:$true] %s61_s30 }
  0x26   :  { %s712_s10 = scalar_lea.hbm %s934_s3, 2048 }
  0x27   :  { %p713_p2 = scmp.ne.s32.totalorder %s934_s3, %s712_s10  ;;  %p716_p3 = scmp.lt.u32.totalorder %s712_s10, %s934_s3 }
  0x29   :  { %p718_p4 = pnand %p716_p3, %p713_p2 }
  0x2b   :  { %721 = shalt.err (!%p718_p4)
}
  0x2c   :  { %s722_s0 = scalar_lea.vmem %s48_s28, 2048  ;;  %p727_p6 = scmp.lt.s32.totalorder %s48_s28, %s48_s28 }
  0x2d   :  { %p723_p5 = scmp.ne.s32.totalorder %s48_s28, %s722_s0  ;;  %p728_p7 = scmp.lt.s32.totalorder %s722_s0, %s722_s0 }
  0x2f   :  { %p729_p8 = por %p728_p7, %p727_p6 }
  0x31   :  { %p730_p9 = pnand %p729_p8, %p723_p5 }
  0x33   :  { %733 = shalt.err (!%p730_p9)
}
  0x34   :  { %53 = dma.hbm_to_vmem [thread:$0]  %s934_s3, 2048, %s48_s28, [#allocation6], %s788_s13, %s788_s13, %s789_s14  }
  0x35   :  { %s734_s20 = scalar_lea.hbm %s936_s5, 2048 }
  0x36   :  { %p735_p10 = scmp.ne.s32.totalorder %s936_s5, %s734_s20  ;;  %p738_p11 = scmp.lt.u32.totalorder %s734_s20, %s936_s5 }
  0x38   :  { %p740_p12 = pnand %p738_p11, %p735_p10 }
  0x3a   :  { %743 = shalt.err (!%p740_p12)
}
  0x3b   :  { %s744_s1 = scalar_lea.vmem %s870_s30, 2048  ;;  %p749_p0 = scmp.lt.s32.totalorder %s870_s30, %s870_s30 }
  0x3c   :  { %p745_p13 = scmp.ne.s32.totalorder %s870_s30, %s744_s1  ;;  %p750_p1 = scmp.lt.s32.totalorder %s744_s1, %s744_s1 }
  0x3e   :  { %p751_p2 = por %p750_p1, %p749_p0 }
  0x40   :  { %p752_p3 = pnand %p751_p2, %p745_p13 }
  0x42   :  { %755 = shalt.err (!%p752_p3)
}
  0x43   :  { %67 = dma.hbm_to_vmem [thread:$0]  %s936_s5, 2048, %s870_s30, [#allocation9], %s788_s13, %s788_s13, %s789_s14  }
  0x44   :  { %778 = dma.done.wait [#allocation3], 256  }
  0x45   :  { %779 = vsyncadd [#allocation3], 4294967040 }
  0x46   :  { %780 = dma.done.wait [#allocation6], 4096  }
  0x47   :  { %781 = vsyncadd [#allocation6], 4294963200 }
  0x48   :  { %782 = dma.done.wait [#allocation9], 2048  }
  0x49   :  { %783 = vsyncadd [#allocation9], 4294965248  ;;  %v84_v0 = vld [vmem:[#allocation5] sm:$0xff]  ;;  %v85_v1 = vld [vmem:[#allocation5 + $0x8] sm:$0xff]  ;;  %s792_s8 = smov [#allocation10]  }
  0x4a   :  { %v86_v2 = vld [vmem:[#allocation5 + $0x10] sm:$0xff]  ;;  %v565_v3 = vpack.c.bf16 %v85_v1, %v84_v0  ;;  %v87_v4 = vld [vmem:[#allocation5 + $0x18] sm:$0xff]  ;;  %v88_v6 = vld [vmem:[#allocation5 + $0x20] sm:$0xff]  ;;  %s389_s9 = sshll.u32 %s792_s8, 4  ;;  %s390_s9 = int_to_ptr.vmem [resolvable:$true] %s389_s9 }
  0x4b   :  { %v569_v5 = vpack.c.bf16 %v87_v4, %v86_v2  ;;  %v89_v7 = vld [vmem:[#allocation5 + $0x28] sm:$0xff]  ;;  %v90_v9 = vld [vmem:[#allocation5 + $0x30] sm:$0xff]  ;;  %v91_v10 = vld [vmem:[#allocation5 + $0x38] sm:$0xff]  ;;  %p761_p5 = scmp.lt.s32.totalorder %s390_s9, %s390_s9 }
  0x4c   :  { %566 = vmatprep.subr.bf16.mxu0 %v565_v3  ;;  %v573_v8 = vpack.c.bf16 %v89_v7, %v88_v6  ;;  %v82_v11 = vld [vmem:[#allocation2] sm:$0xff]  ;;  %v184_v12 = vld [vmem:[#allocation7] sm:$0xff]  ;;  %v185_v13 = vld [vmem:[#allocation7 + $0x8] sm:$0xff]  ;;  %v577_v20 = vpack.c.bf16 %v91_v10, %v90_v9 }
  0x4d   :  { %568 = vmatpush3.bf16.msra.mxu0 %v565_v3  ;;  %492 = vmatprep.mubr.f32.mxu0 %v82_v11  ;;  %v186_v14 = vld [vmem:[#allocation7 + $0x10] sm:$0xff]  ;;  %v597_v15 = vpack.c.bf16 %v185_v13, %v184_v12  ;;  %v187_v16 = vld [vmem:[#allocation7 + $0x18] sm:$0xff]  ;;  %v188_v18 = vld [vmem:[#allocation7 + $0x20] sm:$0xff] }
  0x4e   :  { %570 = vmatprep.subr.bf16.mxu0 %v569_v5  ;;  %v601_v17 = vpack.c.bf16 %v187_v16, %v186_v14  ;;  %v189_v19 = vld [vmem:[#allocation7 + $0x28] sm:$0xff]  ;;  %v92_v21 = vld [vmem:[#allocation5 + $0x40] sm:$0xff]  ;;  %v190_v24 = vld [vmem:[#allocation7 + $0x30] sm:$0xff] }
  0x4f   :  { %598 = vmatprep.subr.bf16.mxu1 %v597_v15  ;;  %v93_v22 = vld [vmem:[#allocation5 + $0x48] sm:$0xff]  ;;  %v605_v23 = vpack.c.bf16 %v189_v19, %v188_v18  ;;  %v191_v25 = vld [vmem:[#allocation7 + $0x38] sm:$0xff]  ;;  %v94_v27 = vld [vmem:[#allocation5 + $0x50] sm:$0xff] }
  0x50   :  { %600 = vmatpush3.bf16.msra.mxu1 %v597_v15  ;;  %v581_v26 = vpack.c.bf16 %v93_v22, %v92_v21  ;;  %v95_v28 = vld [vmem:[#allocation5 + $0x58] sm:$0xff]  ;;  %v609_v29 = vpack.c.bf16 %v191_v25, %v190_v24  ;;  %v192_v30 = vld [vmem:[#allocation7 + $0x40] sm:$0xff]  ;;  %v193_v31 = vld [vmem:[#allocation7 + $0x48] sm:$0xff] }
  0x51   :  { %572 = vmatpush3.bf16.msra.mxu0 %v569_v5  ;;  %602 = vmatprep.subr.bf16.mxu1 %v601_v17  ;;  %v585_v32 = vpack.c.bf16 %v95_v28, %v94_v27  ;;  %v96_v33 = vld [vmem:[#allocation5 + $0x60] sm:$0xff]  ;;  %v97_v34 = vld [vmem:[#allocation5 + $0x68] sm:$0xff]  ;;  %v613_v35 = vpack.c.bf16 %v193_v31, %v192_v30  ;;  %v194_v36 = vld [vmem:[#allocation7 + $0x50] sm:$0xff] }
  0x52   :  { %574 = vmatprep.subr.bf16.mxu0 %v573_v8  ;;  %v195_v37 = vld [vmem:[#allocation7 + $0x58] sm:$0xff]  ;;  %v589_v38 = vpack.c.bf16 %v97_v34, %v96_v33  ;;  %v98_v39 = vld [vmem:[#allocation5 + $0x70] sm:$0xff]  ;;  %v196_v42 = vld [vmem:[#allocation7 + $0x60] sm:$0xff] }
  0x53   :  { %v99_v40 = vld [vmem:[#allocation5 + $0x78] sm:$0xff]  ;;  %v617_v41 = vpack.c.bf16 %v195_v37, %v194_v36  ;;  %v197_v43 = vld [vmem:[#allocation7 + $0x68] sm:$0xff]  ;;  %v198_v47 = vld [vmem:[#allocation7 + $0x70] sm:$0xff] }
  0x54   :  { %604 = vmatpush3.bf16.msra.mxu1 %v601_v17  ;;  %v593_v44 = vpack.c.bf16 %v99_v40, %v98_v39  ;;  %v621_v45 = vpack.c.bf16 %v197_v43, %v196_v42  ;;  %v83_v46 = vld [vmem:[#allocation2 + $0x8] sm:$0xff]  ;;  %v284_v50 = vld [vmem:[#allocation8] sm:$0xff]  ;;  %v285_v51 = vld [vmem:[#allocation8 + $0x8] sm:$0xff] }
  0x55   :  { %576 = vmatpush3.bf16.msra.mxu0 %v573_v8  ;;  %606 = vmatprep.subr.bf16.mxu1 %v605_v23  ;;  %v199_v48 = vld [vmem:[#allocation7 + $0x78] sm:$0xff]  ;;  %v286_v52 = vld [vmem:[#allocation8 + $0x10] sm:$0xff]  ;;  %v629_v53 = vpack.c.bf16 %v285_v51, %v284_v50  ;;  %v288_v56 = vld [vmem:[#allocation8 + $0x20] sm:$0xff] }
  0x56   :  { %578 = vmatprep.subr.bf16.mxu0 %v577_v20  ;;  %v625_v49 = vpack.c.bf16 %v199_v48, %v198_v47  ;;  %v287_v54 = vld [vmem:[#allocation8 + $0x18] sm:$0xff]  ;;  %v289_v57 = vld [vmem:[#allocation8 + $0x28] sm:$0xff]  ;;  %v290_v59 = vld [vmem:[#allocation8 + $0x30] sm:$0xff] }
  0x57   :  { %v633_v55 = vpack.c.bf16 %v287_v54, %v286_v52  ;;  %v637_v58 = vpack.c.bf16 %v289_v57, %v288_v56  ;;  %v291_v60 = vld [vmem:[#allocation8 + $0x38] sm:$0xff]  ;;  %v292_v62 = vld [vmem:[#allocation8 + $0x40] sm:$0xff]  ;;  %v293_v63 = vld [vmem:[#allocation8 + $0x48] sm:$0xff] }
  0x58   :  { %608 = vmatpush3.bf16.msra.mxu1 %v605_v23  ;;  %v641_v61 = vpack.c.bf16 %v291_v60, %v290_v59  ;;  %v645_v0 = vpack.c.bf16 %v293_v63, %v292_v62  ;;  %v294_v1 = vld [vmem:[#allocation8 + $0x50] sm:$0xff]  ;;  %v295_v2 = vld [vmem:[#allocation8 + $0x58] sm:$0xff]  ;;  %v296_v4 = vld [vmem:[#allocation8 + $0x60] sm:$0xff] }
  0x59   :  { %580 = vmatpush3.bf16.msra.mxu0 %v577_v20  ;;  %610 = vmatprep.subr.bf16.mxu1 %v609_v29  ;;  %v649_v3 = vpack.c.bf16 %v295_v2, %v294_v1  ;;  %v297_v5 = vld [vmem:[#allocation8 + $0x68] sm:$0xff]  ;;  %v403_v7 = vld [vmem:[%s933_s2] ss:$0 sm:$0xff]  ;;  %v299_v15 = vld [vmem:[#allocation8 + $0x78] sm:$0xff] }
  0x5a   :  { %582 = vmatprep.subr.bf16.mxu0 %v581_v26  ;;  %v653_v6 = vpack.c.bf16 %v297_v5, %v296_v4  ;;  %v298_v14 = vld [vmem:[#allocation8 + $0x70] sm:$0xff] }
  0x5b   :  { %v657_v16 = vpack.c.bf16 %v299_v15, %v298_v14  ;;  %v404_v17 = vld [vmem:[%s935_s4] ss:$0 sm:$0xff]  ;;  %s756_s4 = scalar_lea.vmem %s390_s9, 256 }
  0x5c   :  { %612 = vmatpush3.bf16.msra.mxu1 %v609_v29  ;;  %v405_v24 = vld [vmem:[%s937_s6] ss:$0 sm:$0xff]  ;;  %p757_p4 = scmp.ne.s32.totalorder %s390_s9, %s756_s4  ;;  %p762_p6 = scmp.lt.s32.totalorder %s756_s4, %s756_s4 }
  0x5d   :  { %584 = vmatpush3.bf16.msra.mxu0 %v581_v26  ;;  %614 = vmatprep.subr.bf16.mxu1 %v613_v35 }
  0x5e   :  { %586 = vmatprep.subr.bf16.mxu0 %v585_v32  ;;  %p763_p7 = por %p762_p6, %p761_p5 }
  0x60   :  { %616 = vmatpush3.bf16.msra.mxu1 %v613_v35  ;;  %p764_p8 = pnand %p763_p7, %p757_p4 }
  0x61   :  { %588 = vmatpush3.bf16.msra.mxu0 %v585_v32  ;;  %618 = vmatprep.subr.bf16.mxu1 %v617_v41 }
  0x62   :  { %590 = vmatprep.subr.bf16.mxu0 %v589_v38 }
  0x64   :  { %620 = vmatpush3.bf16.msra.mxu1 %v617_v41 }
  0x65   :  { %592 = vmatpush3.bf16.msra.mxu0 %v589_v38  ;;  %622 = vmatprep.subr.bf16.mxu1 %v621_v45 }
  0x66   :  { %594 = vmatprep.subr.bf16.mxu0 %v593_v44 }
  0x68   :  { %624 = vmatpush3.bf16.msra.mxu1 %v621_v45 }
  0x69   :  { %596 = vmatpush3.bf16.msra.mxu0 %v593_v44  ;;  %626 = vmatprep.subr.bf16.mxu1 %v625_v49 }
  0x6a   :  { %630 = vmatprep.subr.bf16.mxu0 %v629_v53 }
  0x6c   :  { %493 = vmatmul.mubr.f32.vlgmr.msra.gmra.mrb[0].mxu0 %v83_v46  ;;  %628 = vmatpush3.bf16.msra.mxu1 %v625_v49 }
  0x6d   :  { %632 = vmatpush3.bf16.msra.mxu0 %v629_v53 }
  0x6e   :  { %634 = vmatprep.subr.bf16.mxu0 %v633_v55 }
  0x71   :  { %636 = vmatpush3.bf16.msra.mxu0 %v633_v55 }
  0x72   :  { %638 = vmatprep.subr.bf16.mxu0 %v637_v58 }
  0x75   :  { %640 = vmatpush3.bf16.msra.mxu0 %v637_v58 }
  0x76   :  { %642 = vmatprep.subr.bf16.mxu0 %v641_v61 }
  0x79   :  { %644 = vmatpush3.bf16.msra.mxu0 %v641_v61 }
  0x7a   :  { %646 = vmatprep.subr.bf16.mxu0 %v645_v0 }
  0x7d   :  { %648 = vmatpush3.bf16.msra.mxu0 %v645_v0 }
  0x7e   :  { %650 = vmatprep.subr.bf16.mxu0 %v649_v3 }
  0x81   :  { %652 = vmatpush3.bf16.msra.mxu0 %v649_v3 }
  0x82   :  { %654 = vmatprep.subr.bf16.mxu0 %v653_v6 }
  0x85   :  { %656 = vmatpush3.bf16.msra.mxu0 %v653_v6 }
  0x86   :  { %658 = vmatprep.subr.bf16.mxu0 %v657_v16 }
  0x89   :  { %660 = vmatpush3.bf16.msra.mxu0 %v657_v16 }
 0x13f   :  { %v494_v8 = vpop.f32.mrb[0].mxu0 }
 0x140   :  { %v179_v9 = vadd.f32 %v494_v8, %v403_v7  ;;  %v173_v10 = vpop.f32.mrb[1].mxu0 }
 0x141   :  { %v174_v11 = vadd.f32 %v403_v7, %v173_v10 }
 0x142   :  { %v183_v13 = vmax.f32 %v179_v9, 0.0 }
 0x143   :  { %v182_v12 = vmax.f32 %v174_v11, 0.0 }
 0x145   :  { %527 = vmatprep.mubr.f32.mxu1 %v182_v12 }
 0x146   :  { %528 = vmatmul.mubr.f32.vlgmr.msra.gmra.mrb[0].mxu1 %v183_v13 }
 0x219   :  { %v529_v18 = vpop.f32.mrb[0].mxu1 }
 0x21a   :  { %v279_v19 = vadd.f32 %v529_v18, %v404_v17  ;;  %v273_v20 = vpop.f32.mrb[1].mxu1 }
 0x21b   :  { %v274_v21 = vadd.f32 %v404_v17, %v273_v20 }
 0x21c   :  { %v283_v23 = vmax.f32 %v279_v19, 0.0 }
 0x21d   :  { %v282_v22 = vmax.f32 %v274_v21, 0.0 }
 0x21f   :  { %562 = vmatprep.mubr.f32.mxu0 %v282_v22 }
 0x220   :  { %563 = vmatmul.mubr.f32.vlgmr.msra.gmra.mrb[2].mxu0 %v283_v23 }
 0x2f3   :  { %v564_v25 = vpop.f32.mrb[2].mxu0 }
 0x2f4   :  { %v379_v26 = vadd.f32 %v564_v25, %v405_v24  ;;  %v373_v27 = vpop.f32.mrb[3].mxu0 }
 0x2f5   :  { %v374_v28 = vadd.f32 %v405_v24, %v373_v27 }
 0x2f6   :  { %383 = vst [vmem:[#allocation10 + $0x8] sm:$0xff] %v379_v26 }
 0x2f7   :  { %382 = vst [vmem:[#allocation10] sm:$0xff] %v374_v28 }
 0x2f8   :  { %767 = shalt.err (!%p764_p8)
}
 0x2f9   :  { %s768_s6 = scalar_lea.hbm %s938_s7, 256 }
 0x2fa   :  { %p769_p9 = scmp.ne.s32.totalorder %s938_s7, %s768_s6  ;;  %p772_p10 = scmp.lt.u32.totalorder %s768_s6, %s938_s7 }
 0x2fc   :  { %p774_p11 = pnand %p772_p10, %p769_p9 }
 0x2fe   :  { %777 = shalt.err (!%p774_p11)
}
 0x2ff   :  { %395 = dma.vmem_to_hbm [thread:$0]  %s390_s9, 256, %s938_s7, [#allocation4], %s788_s13, %s788_s13, %s789_s14  }
 0x300   :  { %784 = dma.done.wait [#allocation4], 256  }
 0x301   :  { %785 = vsyncadd [#allocation4], 4294967040 }
 0x302   :  { %399 = vsyncpa [#allocation3], 1 }
 0x303   :  { %400 = vsyncpa [#allocation6], 1 }
 0x304   :  { %401 = vsyncpa [#allocation9], 1 }
 0x305   :  { %402 = vsyncpa [#allocation4], 1 }

// kernel: tpu_custom_call.1
= control target key start
LH: loop header
LB: loop body
LE: loop exit
PB: predicated region body
PF: predicated region fallthrough
CT: control target
= control target key end

     0   :  { %12 = vsyncpa [#allocation3], 0  ;;  %s931_s0 = inlined_call_operand.hbm [shape: f32[16,128], index: 0, kind: input, shape index: {}]   ;;  %s932_s1 = inlined_call_operand.hbm [shape: f32[128,128], index: 1, kind: input, shape index: {}]   ;;  %s933_s2 = inlined_call_operand.vmem [shape: f32[1,128], index: 2, kind: input, shape index: {}]   ;;  %s934_s3 = inlined_call_operand.hbm [shape: f32[128,128], index: 3, kind: input, shape index: {}]   ;;  %s935_s4 = inlined_call_operand.vmem [shape: f32[1,128], index: 4, kind: input, shape index: {}]   ;;  %s936_s5 = inlined_call_operand.hbm [shape: f32[128,128], index: 5, kind: input, shape index: {}]   ;;  %s937_s6 = inlined_call_operand.vmem [shape: f32[1,128], index: 6, kind: input, shape index: {}]   ;;  %s938_s7 = inlined_call_operand.hbm [shape: f32[16,128], index: 7, kind: output, shape index: {}]  }
   0x1   :  { %13 = vsyncpa [#allocation6], 0 }
   0x2   :  { %14 = vsyncpa [#allocation9], 0 }
   0x3   :  { %15 = vsyncpa [#allocation4], 0  ;;  %s786_s24 = smov [#allocation5]   ;;  %s787_s26 = smov [#allocation2]  }
   0x4   :  { %s33_s25 = sshll.u32 %s786_s24, 4  ;;  %s21_s27 = sshll.u32 %s787_s26, 4  ;;  %s34_s25 = int_to_ptr.vmem [resolvable:$true] %s33_s25  ;;  %s833_s27 = int_to_ptr.vmem [resolvable:$true] %s21_s27 }
   0x5   :  { %s668_s30 = scalar_lea.hbm %s932_s1, 2048 }
   0x6   :  { %p669_p0 = scmp.ne.s32.totalorder %s932_s1, %s668_s30  ;;  %p672_p1 = scmp.lt.u32.totalorder %s668_s30, %s932_s1 }
   0x8   :  { %p674_p2 = pnand %p672_p1, %p669_p0 }
   0xa   :  { %677 = shalt.err (!%p674_p2)
}
   0xb   :  { %s678_s12 = scalar_lea.vmem %s34_s25, 2048  ;;  %p683_p4 = scmp.lt.s32.totalorder %s34_s25, %s34_s25 }
   0xc   :  { %p679_p3 = scmp.ne.s32.totalorder %s34_s25, %s678_s12  ;;  %p684_p5 = scmp.lt.s32.totalorder %s678_s12, %s678_s12 }
   0xe   :  { %p685_p6 = por %p684_p5, %p683_p4 }
  0x10   :  { %p686_p7 = pnand %p685_p6, %p679_p3 }
  0x12   :  { %689 = shalt.err (!%p686_p7)
}
  0x13   :  { %s788_s13 = smov 128   ;;  %s789_s14 = smov 8  }
  0x14   :  { %39 = dma.hbm_to_vmem [thread:$0]  %s932_s1, 2048, %s34_s25, [#allocation6], %s788_s13, %s788_s13, %s789_s14  }
  0x15   :  { %s690_s19 = scalar_lea.hbm %s931_s0, 256 }
  0x16   :  { %p691_p8 = scmp.ne.s32.totalorder %s931_s0, %s690_s19  ;;  %p694_p9 = scmp.lt.u32.totalorder %s690_s19, %s931_s0 }
  0x18   :  { %p696_p10 = pnand %p694_p9, %p691_p8 }
  0x1a   :  { %699 = shalt.err (!%p696_p10)
}
  0x1b   :  { %s700_s24 = scalar_lea.vmem %s833_s27, 256  ;;  %p705_p12 = scmp.lt.s32.totalorder %s833_s27, %s833_s27 }
  0x1c   :  { %p701_p11 = scmp.ne.s32.totalorder %s833_s27, %s700_s24  ;;  %p706_p13 = scmp.lt.s32.totalorder %s700_s24, %s700_s24 }
  0x1e   :  { %p707_p0 = por %p706_p13, %p705_p12 }
  0x20   :  { %p708_p1 = pnand %p707_p0, %p701_p11 }
  0x22   :  { %711 = shalt.err (!%p708_p1)
}
  0x23   :  { %27 = dma.hbm_to_vmem [thread:$0]  %s931_s0, 256, %s833_s27, [#allocation3], %s788_s13, %s788_s13, %s789_s14  }
  0x24   :  { %s790_s26 = smov [#allocation7]   ;;  %s791_s29 = smov [#allocation8]  }
  0x25   :  { %s47_s28 = sshll.u32 %s790_s26, 4  ;;  %s61_s30 = sshll.u32 %s791_s29, 4  ;;  %s48_s28 = int_to_ptr.vmem [resolvable:$true] %s47_s28  ;;  %s870_s30 = int_to_ptr.vmem [resolvable:$true] %s61_s30 }
  0x26   :  { %s712_s10 = scalar_lea.hbm %s934_s3, 2048 }
  0x27   :  { %p713_p2 = scmp.ne.s32.totalorder %s934_s3, %s712_s10  ;;  %p716_p3 = scmp.lt.u32.totalorder %s712_s10, %s934_s3 }
  0x29   :  { %p718_p4 = pnand %p716_p3, %p713_p2 }
  0x2b   :  { %721 = shalt.err (!%p718_p4)
}
  0x2c   :  { %s722_s0 = scalar_lea.vmem %s48_s28, 2048  ;;  %p727_p6 = scmp.lt.s32.totalorder %s48_s28, %s48_s28 }
  0x2d   :  { %p723_p5 = scmp.ne.s32.totalorder %s48_s28, %s722_s0  ;;  %p728_p7 = scmp.lt.s32.totalorder %s722_s0, %s722_s0 }
  0x2f   :  { %p729_p8 = por %p728_p7, %p727_p6 }
  0x31   :  { %p730_p9 = pnand %p729_p8, %p723_p5 }
  0x33   :  { %733 = shalt.err (!%p730_p9)
}
  0x34   :  { %53 = dma.hbm_to_vmem [thread:$0]  %s934_s3, 2048, %s48_s28, [#allocation6], %s788_s13, %s788_s13, %s789_s14  }
  0x35   :  { %s734_s20 = scalar_lea.hbm %s936_s5, 2048 }
  0x36   :  { %p735_p10 = scmp.ne.s32.totalorder %s936_s5, %s734_s20  ;;  %p738_p11 = scmp.lt.u32.totalorder %s734_s20, %s936_s5 }
  0x38   :  { %p740_p12 = pnand %p738_p11, %p735_p10 }
  0x3a   :  { %743 = shalt.err (!%p740_p12)
}
  0x3b   :  { %s744_s1 = scalar_lea.vmem %s870_s30, 2048  ;;  %p749_p0 = scmp.lt.s32.totalorder %s870_s30, %s870_s30 }
  0x3c   :  { %p745_p13 = scmp.ne.s32.totalorder %s870_s30, %s744_s1  ;;  %p750_p1 = scmp.lt.s32.totalorder %s744_s1, %s744_s1 }
  0x3e   :  { %p751_p2 = por %p750_p1, %p749_p0 }
  0x40   :  { %p752_p3 = pnand %p751_p2, %p745_p13 }
  0x42   :  { %755 = shalt.err (!%p752_p3)
}
  0x43   :  { %67 = dma.hbm_to_vmem [thread:$0]  %s936_s5, 2048, %s870_s30, [#allocation9], %s788_s13, %s788_s13, %s789_s14  }
  0x44   :  { %778 = dma.done.wait [#allocation3], 256  }
  0x45   :  { %779 = vsyncadd [#allocation3], 4294967040 }
  0x46   :  { %780 = dma.done.wait [#allocation6], 4096  }
  0x47   :  { %781 = vsyncadd [#allocation6], 4294963200 }
  0x48   :  { %782 = dma.done.wait [#allocation9], 2048  }
  0x49   :  { %783 = vsyncadd [#allocation9], 4294965248  ;;  %v84_v0 = vld [vmem:[#allocation5] sm:$0xff]  ;;  %v85_v1 = vld [vmem:[#allocation5 + $0x8] sm:$0xff]  ;;  %s792_s8 = smov [#allocation10]  }
  0x4a   :  { %v86_v2 = vld [vmem:[#allocation5 + $0x10] sm:$0xff]  ;;  %v565_v3 = vpack.c.bf16 %v85_v1, %v84_v0  ;;  %v87_v4 = vld [vmem:[#allocation5 + $0x18] sm:$0xff]  ;;  %v88_v6 = vld [vmem:[#allocation5 + $0x20] sm:$0xff]  ;;  %s389_s9 = sshll.u32 %s792_s8, 4  ;;  %s390_s9 = int_to_ptr.vmem [resolvable:$true] %s389_s9 }
  0x4b   :  { %v569_v5 = vpack.c.bf16 %v87_v4, %v86_v2  ;;  %v89_v7 = vld [vmem:[#allocation5 + $0x28] sm:$0xff]  ;;  %v90_v9 = vld [vmem:[#allocation5 + $0x30] sm:$0xff]  ;;  %v91_v10 = vld [vmem:[#allocation5 + $0x38] sm:$0xff]  ;;  %p761_p5 = scmp.lt.s32.totalorder %s390_s9, %s390_s9 }
  0x4c   :  { %566 = vmatprep.subr.bf16.mxu0 %v565_v3  ;;  %v573_v8 = vpack.c.bf16 %v89_v7, %v88_v6  ;;  %v82_v11 = vld [vmem:[#allocation2] sm:$0xff]  ;;  %v184_v12 = vld [vmem:[#allocation7] sm:$0xff]  ;;  %v185_v13 = vld [vmem:[#allocation7 + $0x8] sm:$0xff]  ;;  %v577_v20 = vpack.c.bf16 %v91_v10, %v90_v9 }
  0x4d   :  { %568 = vmatpush3.bf16.msra.mxu0 %v565_v3  ;;  %492 = vmatprep.mubr.f32.mxu0 %v82_v11  ;;  %v186_v14 = vld [vmem:[#allocation7 + $0x10] sm:$0xff]  ;;  %v597_v15 = vpack.c.bf16 %v185_v13, %v184_v12  ;;  %v187_v16 = vld [vmem:[#allocation7 + $0x18] sm:$0xff]  ;;  %v188_v18 = vld [vmem:[#allocation7 + $0x20] sm:$0xff] }
  0x4e   :  { %570 = vmatprep.subr.bf16.mxu0 %v569_v5  ;;  %v601_v17 = vpack.c.bf16 %v187_v16, %v186_v14  ;;  %v189_v19 = vld [vmem:[#allocation7 + $0x28] sm:$0xff]  ;;  %v92_v21 = vld [vmem:[#allocation5 + $0x40] sm:$0xff]  ;;  %v190_v24 = vld [vmem:[#allocation7 + $0x30] sm:$0xff] }
  0x4f   :  { %598 = vmatprep.subr.bf16.mxu1 %v597_v15  ;;  %v93_v22 = vld [vmem:[#allocation5 + $0x48] sm:$0xff]  ;;  %v605_v23 = vpack.c.bf16 %v189_v19, %v188_v18  ;;  %v191_v25 = vld [vmem:[#allocation7 + $0x38] sm:$0xff]  ;;  %v94_v27 = vld [vmem:[#allocation5 + $0x50] sm:$0xff] }
  0x50   :  { %600 = vmatpush3.bf16.msra.mxu1 %v597_v15  ;;  %v581_v26 = vpack.c.bf16 %v93_v22, %v92_v21  ;;  %v95_v28 = vld [vmem:[#allocation5 + $0x58] sm:$0xff]  ;;  %v609_v29 = vpack.c.bf16 %v191_v25, %v190_v24  ;;  %v192_v30 = vld [vmem:[#allocation7 + $0x40] sm:$0xff]  ;;  %v193_v31 = vld [vmem:[#allocation7 + $0x48] sm:$0xff] }
  0x51   :  { %572 = vmatpush3.bf16.msra.mxu0 %v569_v5  ;;  %602 = vmatprep.subr.bf16.mxu1 %v601_v17  ;;  %v585_v32 = vpack.c.bf16 %v95_v28, %v94_v27  ;;  %v96_v33 = vld [vmem:[#allocation5 + $0x60] sm:$0xff]  ;;  %v97_v34 = vld [vmem:[#allocation5 + $0x68] sm:$0xff]  ;;  %v613_v35 = vpack.c.bf16 %v193_v31, %v192_v30  ;;  %v194_v36 = vld [vmem:[#allocation7 + $0x50] sm:$0xff] }
  0x52   :  { %574 = vmatprep.subr.bf16.mxu0 %v573_v8  ;;  %v195_v37 = vld [vmem:[#allocation7 + $0x58] sm:$0xff]  ;;  %v589_v38 = vpack.c.bf16 %v97_v34, %v96_v33  ;;  %v98_v39 = vld [vmem:[#allocation5 + $0x70] sm:$0xff]  ;;  %v196_v42 = vld [vmem:[#allocation7 + $0x60] sm:$0xff] }
  0x53   :  { %v99_v40 = vld [vmem:[#allocation5 + $0x78] sm:$0xff]  ;;  %v617_v41 = vpack.c.bf16 %v195_v37, %v194_v36  ;;  %v197_v43 = vld [vmem:[#allocation7 + $0x68] sm:$0xff]  ;;  %v198_v47 = vld [vmem:[#allocation7 + $0x70] sm:$0xff] }
  0x54   :  { %604 = vmatpush3.bf16.msra.mxu1 %v601_v17  ;;  %v593_v44 = vpack.c.bf16 %v99_v40, %v98_v39  ;;  %v621_v45 = vpack.c.bf16 %v197_v43, %v196_v42  ;;  %v83_v46 = vld [vmem:[#allocation2 + $0x8] sm:$0xff]  ;;  %v284_v50 = vld [vmem:[#allocation8] sm:$0xff]  ;;  %v285_v51 = vld [vmem:[#allocation8 + $0x8] sm:$0xff] }
  0x55   :  { %576 = vmatpush3.bf16.msra.mxu0 %v573_v8  ;;  %606 = vmatprep.subr.bf16.mxu1 %v605_v23  ;;  %v199_v48 = vld [vmem:[#allocation7 + $0x78] sm:$0xff]  ;;  %v286_v52 = vld [vmem:[#allocation8 + $0x10] sm:$0xff]  ;;  %v629_v53 = vpack.c.bf16 %v285_v51, %v284_v50  ;;  %v288_v56 = vld [vmem:[#allocation8 + $0x20] sm:$0xff] }
  0x56   :  { %578 = vmatprep.subr.bf16.mxu0 %v577_v20  ;;  %v625_v49 = vpack.c.bf16 %v199_v48, %v198_v47  ;;  %v287_v54 = vld [vmem:[#allocation8 + $0x18] sm:$0xff]  ;;  %v289_v57 = vld [vmem:[#allocation8 + $0x28] sm:$0xff]  ;;  %v290_v59 = vld [vmem:[#allocation8 + $0x30] sm:$0xff] }
  0x57   :  { %v633_v55 = vpack.c.bf16 %v287_v54, %v286_v52  ;;  %v637_v58 = vpack.c.bf16 %v289_v57, %v288_v56  ;;  %v291_v60 = vld [vmem:[#allocation8 + $0x38] sm:$0xff]  ;;  %v292_v62 = vld [vmem:[#allocation8 + $0x40] sm:$0xff]  ;;  %v293_v63 = vld [vmem:[#allocation8 + $0x48] sm:$0xff] }
  0x58   :  { %608 = vmatpush3.bf16.msra.mxu1 %v605_v23  ;;  %v641_v61 = vpack.c.bf16 %v291_v60, %v290_v59  ;;  %v645_v0 = vpack.c.bf16 %v293_v63, %v292_v62  ;;  %v294_v1 = vld [vmem:[#allocation8 + $0x50] sm:$0xff]  ;;  %v295_v2 = vld [vmem:[#allocation8 + $0x58] sm:$0xff]  ;;  %v296_v4 = vld [vmem:[#allocation8 + $0x60] sm:$0xff] }
  0x59   :  { %580 = vmatpush3.bf16.msra.mxu0 %v577_v20  ;;  %610 = vmatprep.subr.bf16.mxu1 %v609_v29  ;;  %v649_v3 = vpack.c.bf16 %v295_v2, %v294_v1  ;;  %v297_v5 = vld [vmem:[#allocation8 + $0x68] sm:$0xff]  ;;  %v403_v7 = vld [vmem:[%s933_s2] ss:$0 sm:$0xff]  ;;  %v299_v15 = vld [vmem:[#allocation8 + $0x78] sm:$0xff] }
  0x5a   :  { %582 = vmatprep.subr.bf16.mxu0 %v581_v26  ;;  %v653_v6 = vpack.c.bf16 %v297_v5, %v296_v4  ;;  %v298_v14 = vld [vmem:[#allocation8 + $0x70] sm:$0xff] }
  0x5b   :  { %v657_v16 = vpack.c.bf16 %v299_v15, %v298_v14  ;;  %v404_v17 = vld [vmem:[%s935_s4] ss:$0 sm:$0xff]  ;;  %s756_s4 = scalar_lea.vmem %s390_s9, 256 }
  0x5c   :  { %612 = vmatpush3.bf16.msra.mxu1 %v609_v29  ;;  %v405_v24 = vld [vmem:[%s937_s6] ss:$0 sm:$0xff]  ;;  %p757_p4 = scmp.ne.s32.totalorder %s390_s9, %s756_s4  ;;  %p762_p6 = scmp.lt.s32.totalorder %s756_s4, %s756_s4 }
  0x5d   :  { %584 = vmatpush3.bf16.msra.mxu0 %v581_v26  ;;  %614 = vmatprep.subr.bf16.mxu1 %v613_v35 }
  0x5e   :  { %586 = vmatprep.subr.bf16.mxu0 %v585_v32  ;;  %p763_p7 = por %p762_p6, %p761_p5 }
  0x60   :  { %616 = vmatpush3.bf16.msra.mxu1 %v613_v35  ;;  %p764_p8 = pnand %p763_p7, %p757_p4 }
  0x61   :  { %588 = vmatpush3.bf16.msra.mxu0 %v585_v32  ;;  %618 = vmatprep.subr.bf16.mxu1 %v617_v41 }
  0x62   :  { %590 = vmatprep.subr.bf16.mxu0 %v589_v38 }
  0x64   :  { %620 = vmatpush3.bf16.msra.mxu1 %v617_v41 }
  0x65   :  { %592 = vmatpush3.bf16.msra.mxu0 %v589_v38  ;;  %622 = vmatprep.subr.bf16.mxu1 %v621_v45 }
  0x66   :  { %594 = vmatprep.subr.bf16.mxu0 %v593_v44 }
  0x68   :  { %624 = vmatpush3.bf16.msra.mxu1 %v621_v45 }
  0x69   :  { %596 = vmatpush3.bf16.msra.mxu0 %v593_v44  ;;  %626 = vmatprep.subr.bf16.mxu1 %v625_v49 }
  0x6a   :  { %630 = vmatprep.subr.bf16.mxu0 %v629_v53 }
  0x6c   :  { %493 = vmatmul.mubr.f32.vlgmr.msra.gmra.mrb[0].mxu0 %v83_v46  ;;  %628 = vmatpush3.bf16.msra.mxu1 %v625_v49 }
  0x6d   :  { %632 = vmatpush3.bf16.msra.mxu0 %v629_v53 }
  0x6e   :  { %634 = vmatprep.subr.bf16.mxu0 %v633_v55 }
  0x71   :  { %636 = vmatpush3.bf16.msra.mxu0 %v633_v55 }
  0x72   :  { %638 = vmatprep.subr.bf16.mxu0 %v637_v58 }
  0x75   :  { %640 = vmatpush3.bf16.msra.mxu0 %v637_v58 }
  0x76   :  { %642 = vmatprep.subr.bf16.mxu0 %v641_v61 }
  0x79   :  { %644 = vmatpush3.bf16.msra.mxu0 %v641_v61 }
  0x7a   :  { %646 = vmatprep.subr.bf16.mxu0 %v645_v0 }
  0x7d   :  { %648 = vmatpush3.bf16.msra.mxu0 %v645_v0 }
  0x7e   :  { %650 = vmatprep.subr.bf16.mxu0 %v649_v3 }
  0x81   :  { %652 = vmatpush3.bf16.msra.mxu0 %v649_v3 }
  0x82   :  { %654 = vmatprep.subr.bf16.mxu0 %v653_v6 }
  0x85   :  { %656 = vmatpush3.bf16.msra.mxu0 %v653_v6 }
  0x86   :  { %658 = vmatprep.subr.bf16.mxu0 %v657_v16 }
  0x89   :  { %660 = vmatpush3.bf16.msra.mxu0 %v657_v16 }
 0x13f   :  { %v494_v8 = vpop.f32.mrb[0].mxu0 }
 0x140   :  { %v179_v9 = vadd.f32 %v494_v8, %v403_v7  ;;  %v173_v10 = vpop.f32.mrb[1].mxu0 }
 0x141   :  { %v174_v11 = vadd.f32 %v403_v7, %v173_v10 }
 0x142   :  { %v183_v13 = vmax.f32 %v179_v9, 0.0 }
 0x143   :  { %v182_v12 = vmax.f32 %v174_v11, 0.0 }
 0x145   :  { %527 = vmatprep.mubr.f32.mxu1 %v182_v12 }
 0x146   :  { %528 = vmatmul.mubr.f32.vlgmr.msra.gmra.mrb[0].mxu1 %v183_v13 }
 0x219   :  { %v529_v18 = vpop.f32.mrb[0].mxu1 }
 0x21a   :  { %v279_v19 = vadd.f32 %v529_v18, %v404_v17  ;;  %v273_v20 = vpop.f32.mrb[1].mxu1 }
 0x21b   :  { %v274_v21 = vadd.f32 %v404_v17, %v273_v20 }
 0x21c   :  { %v283_v23 = vmax.f32 %v279_v19, 0.0 }
 0x21d   :  { %v282_v22 = vmax.f32 %v274_v21, 0.0 }
 0x21f   :  { %562 = vmatprep.mubr.f32.mxu0 %v282_v22 }
 0x220   :  { %563 = vmatmul.mubr.f32.vlgmr.msra.gmra.mrb[2].mxu0 %v283_v23 }
 0x2f3   :  { %v564_v25 = vpop.f32.mrb[2].mxu0 }
 0x2f4   :  { %v379_v26 = vadd.f32 %v564_v25, %v405_v24  ;;  %v373_v27 = vpop.f32.mrb[3].mxu0 }
 0x2f5   :  { %v374_v28 = vadd.f32 %v405_v24, %v373_v27 }
 0x2f6   :  { %383 = vst [vmem:[#allocation10 + $0x8] sm:$0xff] %v379_v26 }
 0x2f7   :  { %382 = vst [vmem:[#allocation10] sm:$0xff] %v374_v28 }
 0x2f8   :  { %767 = shalt.err (!%p764_p8)
}
 0x2f9   :  { %s768_s6 = scalar_lea.hbm %s938_s7, 256 }
 0x2fa   :  { %p769_p9 = scmp.ne.s32.totalorder %s938_s7, %s768_s6  ;;  %p772_p10 = scmp.lt.u32.totalorder %s768_s6, %s938_s7 }
 0x2fc   :  { %p774_p11 = pnand %p772_p10, %p769_p9 }
 0x2fe   :  { %777 = shalt.err (!%p774_p11)
}
 0x2ff   :  { %395 = dma.vmem_to_hbm [thread:$0]  %s390_s9, 256, %s938_s7, [#allocation4], %s788_s13, %s788_s13, %s789_s14  }
 0x300   :  { %784 = dma.done.wait [#allocation4], 256  }
 0x301   :  { %785 = vsyncadd [#allocation4], 4294967040 }
 0x302   :  { %399 = vsyncpa [#allocation3], 1 }
 0x303   :  { %400 = vsyncpa [#allocation6], 1 }
 0x304   :  { %401 = vsyncpa [#allocation9], 1 }
 0x305   :  { %402 = vsyncpa [#allocation4], 1 }

</bundles_post_ra>
